<compile_context>
chip_gen: v7x
topology: tpu7x:2x2x1
jax: 0.10.0
libtpu: 0.0.40
codegen_flags: <defaults>
</compile_context>

<pallas_src>
import jax
import jax.numpy as jnp
from jax.experimental import pallas as pl
from jax.experimental.pallas import tpu as pltpu


def _sim_kernel(p_land_ref, p_theta_ref, w_land_ref, expand_ref,
                w_theta_tiled_ref, out_ref):
    d_land = w_land_ref.shape[1]
    d_theta = w_theta_tiled_ref.shape[1]

    p_land = p_land_ref[...]                                   # (TB, L)

    # expected landmark embedding: (TB, L) @ (L, D_LAND) -> (TB, D_LAND)  [MXU]
    e_land = jnp.dot(p_land, w_land_ref[...],
                     preferred_element_type=jnp.float32)

    # Broadcast p_land along the T-fast axis with one tiny MXU dot against a
    # constant 0/1 expansion matrix (L, L*T):  rep[b, l*T + t] = p_land[b, l].
    # (Avoids a lane-level repeat / sublane relayout on the VPU/XLU.)
    p_land_rep = jnp.dot(p_land, expand_ref[...],
                         preferred_element_type=jnp.float32)   # (TB, L*T)

    # Scale and contract over the joint (L*T) axis against the row-tiled theta
    # table: equivalent to sum_l P_theta[b,l,t]*P_land[b,l] then @ W_theta.
    scaled = p_theta_ref[...] * p_land_rep                     # VPU, same layout
    e_theta = jnp.dot(scaled, w_theta_tiled_ref[...],
                      preferred_element_type=jnp.float32)      # (TB, D_THETA)

    # Store into disjoint static lane ranges; no concat materialization.
    out_ref[:, 0:d_land] = e_land.astype(out_ref.dtype)
    out_ref[:, d_land:d_land + d_theta] = e_theta.astype(out_ref.dtype)


def symbolic_instruction_module_probabilities(
    probabilities_landmark, probabilities_theta, landmark_weight, theta_weight
):
    b, l = probabilities_landmark.shape
    _, l2, t = probabilities_theta.shape
    assert l2 == l
    d_land = landmark_weight.shape[1]
    d_theta = theta_weight.shape[1]

    # Lane-dense flatten of the theta probabilities: (B, L, T) -> (B, L*T).
    p_theta_flat = probabilities_theta.reshape(b, l * t)

    # Row-tiled theta table (L*T, D_THETA): tiled[l*T + t, :] = W_theta[t, :].
    w_theta_tiled = jnp.tile(theta_weight, (l, 1))

    # 0/1 expansion matrix (L, L*T): expand[l, l*T + t] = 1.
    expand = jnp.repeat(jnp.eye(l, dtype=probabilities_landmark.dtype), t, axis=1)

    # Batch tiling: large tiles amortize per-step overhead and fill the MXU's
    # M dimension; working set per tile stays far below every generation's
    # scoped-VMEM default, so no vmem_limit override is needed.
    tb = b if b <= 1024 else 1024
    grid = (pl.cdiv(b, tb),)

    return pl.pallas_call(
        _sim_kernel,
        out_shape=jax.ShapeDtypeStruct((b, d_land + d_theta), jnp.float32),
        grid_spec=pltpu.PrefetchScalarGridSpec(
            num_scalar_prefetch=0,
            grid=grid,
            in_specs=[
                pl.BlockSpec((tb, l), lambda i: (i, 0)),          # P_land tile
                pl.BlockSpec((tb, l * t), lambda i: (i, 0)),      # P_theta tile
                pl.BlockSpec((l, d_land), lambda i: (0, 0)),      # W_land (resident)
                pl.BlockSpec((l, l * t), lambda i: (0, 0)),       # expand (resident)
                pl.BlockSpec((l * t, d_theta), lambda i: (0, 0)), # W_theta tiled (resident)
            ],
            out_specs=pl.BlockSpec((tb, d_land + d_theta), lambda i: (i, 0)),
        ),
        compiler_params=pltpu.CompilerParams(
            dimension_semantics=("parallel",),
        ),
    )(probabilities_landmark, p_theta_flat, landmark_weight, expand, w_theta_tiled)


def _reference(p_land, p_theta, w_land, w_theta):
    e_land = p_land @ w_land
    marg_theta = jnp.einsum("blt,bl->bt", p_theta, p_land)
    e_theta = marg_theta @ w_theta
    return jnp.concatenate([e_land, e_theta], axis=1)


if __name__ == "__main__":
    # Small shapes consistent with the module's forward.
    B, L, T = 2, 8, 4          # batch, num landmarks, num theta bins
    D_LAND, D_THETA = 32, 32   # embedding dims

    key = jax.random.PRNGKey(0)
    k1, k2, k3, k4, k5 = jax.random.split(key, 5)

    probabilities_landmark = jax.nn.softmax(
        jax.random.normal(k1, (B, L), dtype=jnp.float32), axis=-1
    )
    probabilities_theta = jax.nn.softmax(
        jax.random.normal(k2, (B, L, T), dtype=jnp.float32), axis=-1
    )
    landmark_weight = jax.random.normal(k3, (L, D_LAND), dtype=jnp.float32)
    theta_weight = jax.random.normal(k4, (T, D_THETA), dtype=jnp.float32)

    # symbolic_instructions_batch is accepted by the module but unused by the
    # forward compute (only the probability tensors and tables matter).
    symbolic_instructions_batch = jax.random.randint(k5, (B, 6), 0, 10)  # noqa: F841

    out = symbolic_instruction_module_probabilities(
        probabilities_landmark, probabilities_theta, landmark_weight, theta_weight
    )
    out = jax.block_until_ready(out)
    ref = _reference(
        probabilities_landmark, probabilities_theta, landmark_weight, theta_weight
    )
    assert out.shape == (B, D_LAND + D_THETA)
    assert jnp.allclose(out, ref, atol=1e-5, rtol=1e-5)

    # Larger batch to exercise the batch grid / double-buffered pipeline path.
    B2 = 4096
    kb1, kb2 = jax.random.split(jax.random.PRNGKey(1), 2)
    p_land_big = jax.nn.softmax(
        jax.random.normal(kb1, (B2, L), dtype=jnp.float32), axis=-1
    )
    p_theta_big = jax.nn.softmax(
        jax.random.normal(kb2, (B2, L, T), dtype=jnp.float32), axis=-1
    )
    out_big = jax.block_until_ready(
        symbolic_instruction_module_probabilities(
            p_land_big, p_theta_big, landmark_weight, theta_weight
        )
    )
    ref_big = _reference(p_land_big, p_theta_big, landmark_weight, theta_weight)
    assert out_big.shape == (B2, D_LAND + D_THETA)
    assert jnp.allclose(out_big, ref_big, atol=1e-4, rtol=1e-4)

    print("KERNEL_OK")
</pallas_src>

<mosaic_0001>
module attributes {stable_mosaic.version = 11 : i64} {
  func.func @_sim_kernel(%arg0: i32, %arg1: memref<2x8xf32, #tpu.memory_space<vmem>>, %arg2: memref<2x32xf32, #tpu.memory_space<vmem>>, %arg3: memref<8x32xf32, #tpu.memory_space<vmem>>, %arg4: memref<8x32xf32, #tpu.memory_space<vmem>>, %arg5: memref<32x32xf32, #tpu.memory_space<vmem>>, %arg6: memref<2x64xf32, #tpu.memory_space<vmem>>) attributes {dimension_semantics = [#tpu.dimension_semantics<parallel>], iteration_bounds = array<i64: 1>, scalar_prefetch = 0 : i64, scratch_operands = 0 : i64, tpu.core_type = #tpu.core_type<tc>, window_params = [{transform_indices = @transform_0, window_bounds = array<i64: 2, 8>}, {transform_indices = @transform_1, window_bounds = array<i64: 2, 32>}, {pipeline_mode = #tpu.pipeline_mode<synchronous>, transform_indices = @transform_2, window_bounds = array<i64: 8, 32>}, {pipeline_mode = #tpu.pipeline_mode<synchronous>, transform_indices = @transform_3, window_bounds = array<i64: 8, 32>}, {pipeline_mode = #tpu.pipeline_mode<synchronous>, transform_indices = @transform_4, window_bounds = array<i64: 32, 32>}, {transform_indices = @transform_5, window_bounds = array<i64: 2, 64>}]} {
    %c0 = arith.constant 0 : index
    %c0_0 = arith.constant 0 : index
    %0 = vector.load %arg1[%c0, %c0_0] : memref<2x8xf32, #tpu.memory_space<vmem>>, vector<2x8xf32>
    %c0_1 = arith.constant 0 : index
    %c0_2 = arith.constant 0 : index
    %1 = vector.load %arg3[%c0_1, %c0_2] : memref<8x32xf32, #tpu.memory_space<vmem>>, vector<8x32xf32>
    %cst = arith.constant dense<0.000000e+00> : vector<2x32xf32>
    %2 = tpu.matmul %0, %1, %cst {dimension_numbers = #tpu.dot_dimension_numbers<[1], [0], [0], [1], [0, 0, 1, 1], [], []>} : vector<2x8xf32>, vector<8x32xf32>, vector<2x32xf32> -> vector<2x32xf32>
    %c0_3 = arith.constant 0 : index
    %c0_4 = arith.constant 0 : index
    %3 = vector.load %arg4[%c0_3, %c0_4] : memref<8x32xf32, #tpu.memory_space<vmem>>, vector<8x32xf32>
    %cst_5 = arith.constant dense<0.000000e+00> : vector<2x32xf32>
    %4 = tpu.matmul %0, %3, %cst_5 {dimension_numbers = #tpu.dot_dimension_numbers<[1], [0], [0], [1], [0, 0, 1, 1], [], []>} : vector<2x8xf32>, vector<8x32xf32>, vector<2x32xf32> -> vector<2x32xf32>
    %c0_6 = arith.constant 0 : index
    %c0_7 = arith.constant 0 : index
    %5 = vector.load %arg2[%c0_6, %c0_7] : memref<2x32xf32, #tpu.memory_space<vmem>>, vector<2x32xf32>
    %6 = arith.mulf %5, %4 : vector<2x32xf32>
    %c0_8 = arith.constant 0 : index
    %c0_9 = arith.constant 0 : index
    %7 = vector.load %arg5[%c0_8, %c0_9] : memref<32x32xf32, #tpu.memory_space<vmem>>, vector<32x32xf32>
    %cst_10 = arith.constant dense<0.000000e+00> : vector<2x32xf32>
    %8 = tpu.matmul %6, %7, %cst_10 {dimension_numbers = #tpu.dot_dimension_numbers<[1], [0], [0], [1], [0, 0, 1, 1], [], []>} : vector<2x32xf32>, vector<32x32xf32>, vector<2x32xf32> -> vector<2x32xf32>
    %c0_11 = arith.constant 0 : index
    %c0_12 = arith.constant 0 : index
    %9 = vector.load %arg6[%c0_11, %c0_12] : memref<2x64xf32, #tpu.memory_space<vmem>>, vector<2x32xf32>
    tpu.vector_store %arg6[%c0_11, %c0_12], %2 {strides = array<i32>} : memref<2x64xf32, #tpu.memory_space<vmem>>, vector<2x32xf32>,
    %c0_13 = arith.constant 0 : index
    %c32 = arith.constant 32 : index
    %10 = vector.load %arg6[%c0_13, %c32] : memref<2x64xf32, #tpu.memory_space<vmem>>, vector<2x32xf32>
    tpu.vector_store %arg6[%c0_13, %c32], %8 {strides = array<i32>} : memref<2x64xf32, #tpu.memory_space<vmem>>, vector<2x32xf32>,
    return
  }
  func.func @transform_0(%arg0: i32) -> (i32, i32) {
    %c0_i32 = arith.constant 0 : i32
    %c0_i32_0 = arith.constant 0 : i32
    return %arg0, %c0_i32 : i32, i32
  }
  func.func @transform_1(%arg0: i32) -> (i32, i32) {
    %c0_i32 = arith.constant 0 : i32
    %c0_i32_0 = arith.constant 0 : i32
    return %arg0, %c0_i32 : i32, i32
  }
  func.func @transform_2(%arg0: i32) -> (i32, i32) {
    %c0_i32 = arith.constant 0 : i32
    %c0_i32_0 = arith.constant 0 : i32
    %c0_i32_1 = arith.constant 0 : i32
    return %c0_i32, %c0_i32_0 : i32, i32
  }
  func.func @transform_3(%arg0: i32) -> (i32, i32) {
    %c0_i32 = arith.constant 0 : i32
    %c0_i32_0 = arith.constant 0 : i32
    %c0_i32_1 = arith.constant 0 : i32
    return %c0_i32, %c0_i32_0 : i32, i32
  }
  func.func @transform_4(%arg0: i32) -> (i32, i32) {
    %c0_i32 = arith.constant 0 : i32
    %c0_i32_0 = arith.constant 0 : i32
    %c0_i32_1 = arith.constant 0 : i32
    return %c0_i32, %c0_i32_0 : i32, i32
  }
  func.func @transform_5(%arg0: i32) -> (i32, i32) {
    %c0_i32 = arith.constant 0 : i32
    %c0_i32_0 = arith.constant 0 : i32
    return %arg0, %c0_i32 : i32, i32
  }
}

</mosaic_0001>

<bundles_post_ra>
// kernel: tpu_custom_call.1
= control target key start
LH: loop header
LB: loop body
LE: loop exit
PB: predicated region body
PF: predicated region fallthrough
CT: control target
= control target key end

     0   :  { %10 = vsyncpa [#allocation3], 0  ;;  %s546_s0 = inlined_call_operand.hbm [shape: f32[2,8], index: 0, kind: input, shape index: {}]   ;;  %s547_s1 = inlined_call_operand.vmem [shape: f32[2,32], index: 1, kind: input, shape index: {}]   ;;  %s548_s2 = inlined_call_operand.hbm [shape: f32[8,32], index: 2, kind: input, shape index: {}]   ;;  %s549_s3 = inlined_call_operand.vmem [shape: f32[8,32], index: 3, kind: input, shape index: {}]   ;;  %s550_s4 = inlined_call_operand.hbm [shape: f32[32,32], index: 4, kind: input, shape index: {}]   ;;  %s551_s5 = inlined_call_operand.hbm [shape: f32[2,64], index: 5, kind: output, shape index: {}]  }
   0x1   :  { %11 = vsyncpa [#allocation6], 0 }
   0x2   :  { %12 = vsyncpa [#allocation4], 0  ;;  %s452_s18 = smov [#allocation5]   ;;  %s453_s20 = smov [#allocation2]  }
   0x3   :  { %s31_s19 = sshll.u32 %s452_s18, 4  ;;  %s19_s21 = sshll.u32 %s453_s20, 4  ;;  %s32_s19 = int_to_ptr.vmem [resolvable:$true] %s31_s19  ;;  %s20_s21 = int_to_ptr.vmem [resolvable:$true] %s19_s21 }
   0x4   :  { %s358_s24 = scalar_lea.hbm %s548_s2, 128 }
   0x5   :  { %p359_p0 = scmp.ne.s32.totalorder %s548_s2, %s358_s24  ;;  %p362_p1 = scmp.lt.u32.totalorder %s358_s24, %s548_s2 }
   0x7   :  { %p364_p2 = pnand %p362_p1, %p359_p0 }
   0x9   :  { %367 = shalt.err (!%p364_p2)
}
   0xa   :  { %s368_s29 = scalar_lea.vmem %s32_s19, 128  ;;  %p373_p4 = scmp.lt.s32.totalorder %s32_s19, %s32_s19 }
   0xb   :  { %p369_p3 = scmp.ne.s32.totalorder %s32_s19, %s368_s29  ;;  %p374_p5 = scmp.lt.s32.totalorder %s368_s29, %s368_s29 }
   0xd   :  { %p375_p6 = por %p374_p5, %p373_p4 }
   0xf   :  { %p376_p7 = pnand %p375_p6, %p369_p3 }
  0x11   :  { %379 = shalt.err (!%p376_p7)
}
  0x12   :  { %34 = dma.hbm_to_vmem [thread:$0]  %s548_s2, 128, %s32_s19, [#allocation6]  }
  0x13   :  { %s380_s9 = scalar_lea.hbm %s546_s0, 32 }
  0x14   :  { %p381_p8 = scmp.ne.s32.totalorder %s546_s0, %s380_s9  ;;  %p384_p9 = scmp.lt.u32.totalorder %s380_s9, %s546_s0 }
  0x16   :  { %p386_p10 = pnand %p384_p9, %p381_p8 }
  0x18   :  { %389 = shalt.err (!%p386_p10)
}
  0x19   :  { %s390_s14 = scalar_lea.vmem %s20_s21, 32  ;;  %p395_p12 = scmp.lt.s32.totalorder %s20_s21, %s20_s21 }
  0x1a   :  { %p391_p11 = scmp.ne.s32.totalorder %s20_s21, %s390_s14  ;;  %p396_p13 = scmp.lt.s32.totalorder %s390_s14, %s390_s14 }
  0x1c   :  { %p397_p0 = por %p396_p13, %p395_p12 }
  0x1e   :  { %p398_p1 = pnand %p397_p0, %p391_p11 }
  0x20   :  { %401 = shalt.err (!%p398_p1)
}
  0x21   :  { %22 = dma.hbm_to_vmem [thread:$0]  %s546_s0, 32, %s20_s21, [#allocation3]  }
  0x22   :  { %s454_s16 = smov [#allocation7]   ;;  %s402_s20 = scalar_lea.hbm %s550_s4, 512 }
  0x23   :  { %s42_s17 = sshll.u32 %s454_s16, 4  ;;  %p403_p2 = scmp.ne.s32.totalorder %s550_s4, %s402_s20  ;;  %s43_s17 = int_to_ptr.vmem [resolvable:$true] %s42_s17 }
  0x24   :  { %p406_p3 = scmp.lt.u32.totalorder %s402_s20, %s550_s4 }
  0x26   :  { %p408_p4 = pnand %p406_p3, %p403_p2 }
  0x28   :  { %411 = shalt.err (!%p408_p4)
}
  0x29   :  { %s412_s26 = scalar_lea.vmem %s43_s17, 512  ;;  %p417_p6 = scmp.lt.s32.totalorder %s43_s17, %s43_s17 }
  0x2a   :  { %p413_p5 = scmp.ne.s32.totalorder %s43_s17, %s412_s26  ;;  %p418_p7 = scmp.lt.s32.totalorder %s412_s26, %s412_s26 }
  0x2c   :  { %p419_p8 = por %p418_p7, %p417_p6 }
  0x2e   :  { %p420_p9 = pnand %p419_p8, %p413_p5 }
  0x30   :  { %423 = shalt.err (!%p420_p9)
}
  0x31   :  { %s455_s0 = smov 128   ;;  %s456_s21 = smov 8  }
  0x32   :  { %48 = dma.hbm_to_vmem [thread:$0]  %s550_s4, 512, %s43_s17, [#allocation6], %s455_s0, %s455_s0, %s456_s21  }
  0x33   :  { %446 = dma.done.wait [#allocation3], 32  }
  0x34   :  { %447 = vsyncadd [#allocation3], 4294967264 }
  0x35   :  { %448 = dma.done.wait [#allocation6], 640  }
  0x36   :  { %449 = vsyncadd [#allocation6], 4294966656  ;;  %v457_v0 = vmov 0.0   ;;  %vm458_vm0 = vmmov 0   ;;  %v459_v1 = vmov 0.0|0.0   ;;  %vm60_vm1 = vcmask 64512  }
  0x37   :  { %321 = vmatprep.subr.mxu1 %v457_v0  ;;  %323 = vmatprep.mubr.msk.f32.mxu1 %vm458_vm0, %v457_v0  ;;  %v59_v2 = vld [vmem:[#allocation5] sm:$0xff]  ;;  %v58_v3 = vld [vmem:[#allocation2] sm:$0x3]  ;;  %v134_v4 = vld [vmem:[%s549_s3] sm:$0xff]  ;;  %vm285_vm2 = vcmask 254976   ;;  %vm211_vm3 = vcmask 261120  }
  0x38   :  { %342 = vmatprep.subr.bf16.mxu0 %v459_v1  ;;  %339 = vmatprep.mubr.msk.f32.mxu0 %vm458_vm0, %v457_v0  ;;  %v207_v5 = vld [vmem:[#allocation7] sm:$0xff]  ;;  %v208_v6 = vld [vmem:[#allocation7 + $0x8] sm:$0xff]  ;;  %v209_v8 = vld [vmem:[#allocation7 + $0x10] sm:$0xff]  ;;  %s460_s6 = smov 32   ;;  %s461_s7 = smov [#allocation8]   ;;  %vm291_vm4 = vcmask 517376  }
  0x39   :  { %322 = vmatpush3.msra.mxu1 %v59_v2  ;;  %v343_v7 = vpack.c.bf16 %v208_v6, %v207_v5  ;;  %v210_v9 = vld [vmem:[#allocation7 + $0x18] sm:$0xff]  ;;  %v205_v13 = vld [vmem:[%s547_s1] sm:$0x3]  ;;  %s299_s8 = sshll.u32 %s461_s7, 4  ;;  %s300_s8 = int_to_ptr.vmem [resolvable:$true] %s299_s8 }
  0x3a   :  { %324 = vmatmul.mubr.msk.f32.vlgmr.msra.gmra.mrb[0].mxu1 %vm60_vm1, %v58_v3  ;;  %326 = vmatprep.subr.mxu1 %v457_v0  ;;  %v346_v10 = vpack.c.bf16 %v210_v9, %v209_v8  ;;  %s424_s9 = scalar_lea.vmem %s300_s8, 32  ;;  %p429_p11 = scmp.lt.s32.totalorder %s300_s8, %s300_s8 }
  0x3b   :  { %327 = vmatpush3.msra.mxu1 %v134_v4  ;;  %328 = vmatprep.mubr.msk.f32.mxu1 %vm458_vm0, %v457_v0  ;;  %p425_p10 = scmp.ne.s32.totalorder %s300_s8, %s424_s9  ;;  %p430_p12 = scmp.lt.s32.totalorder %s424_s9, %s424_s9 }
  0x3c   :  { %344 = vmatpush3.bf16.msra.mxu0 %v343_v7 }
  0x3d   :  { %345 = vmatprep.subr.bf16.mxu0 %v459_v1  ;;  %p431_p13 = por %p430_p12, %p429_p11 }
  0x3e   :  { %329 = vmatmul.mubr.msk.f32.vlgmr.msra.gmra.mrb[2].mxu1 %vm60_vm1, %v58_v3 }
  0x3f   :  { %p432_p0 = pnand %p431_p13, %p425_p10 }
  0x40   :  { %347 = vmatpush3.bf16.msra.mxu0 %v346_v10 }
 0x10d   :  { %v130_v11 = vpop.f32.mrb[0].mxu1 }
 0x10e   :  { %286 = vst.msk [vmem:[#allocation8] sm:$0x3] %vm285_vm2, %v130_v11  ;;  %v325_v12 = vpop.f32.mrb[1].mxu1 }
 0x111   :  { %v201_v14 = vpop.f32.mrb[2].mxu1 }
 0x112   :  { %v206_v15 = vmul.f32 %v205_v13, %v201_v14  ;;  %v330_v16 = vpop.f32.mrb[3].mxu1 }
 0x114   :  { %340 = vmatmul.mubr.msk.f32.vlgmr.msra.gmra.mrb[0].mxu0 %vm211_vm3, %v206_v15 }
 0x1e7   :  { %v281_v17 = vpop.f32.mrb[0].mxu0 }
 0x1e8   :  { %v341_v18 = vpop.f32.mrb[1].mxu0  ;;  %288 = vrot.lane.b32.xlu0 %v281_v17, %s460_s6 }
 0x25a   :  { %v289_v19 = vpop.permute.xlu0 %288 }
 0x25b   :  { %292 = vst.msk [vmem:[#allocation8] sm:$0x3] %vm291_vm4, %v289_v19 }
 0x25c   :  { %435 = shalt.err (!%p432_p0)
}
 0x25d   :  { %s436_s11 = scalar_lea.hbm %s551_s5, 32 }
 0x25e   :  { %p437_p1 = scmp.ne.s32.totalorder %s551_s5, %s436_s11  ;;  %p440_p2 = scmp.lt.u32.totalorder %s436_s11, %s551_s5 }
 0x260   :  { %p442_p3 = pnand %p440_p2, %p437_p1 }
 0x262   :  { %445 = shalt.err (!%p442_p3)
}
 0x263   :  { %302 = dma.vmem_to_hbm [thread:$0]  %s300_s8, 32, %s551_s5, [#allocation4]  }
 0x264   :  { %450 = dma.done.wait [#allocation4], 32  }
 0x265   :  { %451 = vsyncadd [#allocation4], 4294967264 }
 0x266   :  { %306 = vsyncpa [#allocation3], 1 }
 0x267   :  { %307 = vsyncpa [#allocation6], 1 }
 0x268   :  { %308 = vsyncpa [#allocation4], 1 }

</bundles_post_ra>
